<compile_context>
chip_gen: v7x
topology: tpu7x:2x2x1
jax: 0.10.0
libtpu: 0.0.40
codegen_flags: <defaults>
</compile_context>

<pallas_src>
import functools

import jax
import jax.numpy as jnp
import numpy as np
from jax.experimental import pallas as pl
from jax.experimental.pallas import tpu as pltpu
from jax.scipy.special import gammaln

_LANES = 128
_MAX_BLOCK_ROWS = 4096   # 4096 * 128 * 4B = 2 MiB per input tile
_MIN_GRID_STEPS = 4      # keep >=4 grid steps so v7x's 2 TCs both get work

# Lanczos g=5, n=6 (Numerical Recipes coefficient set).
# Valid for z >= -0.5 in A(z), i.e. r = exp(log_w) >= 0.5 when t = 0 (true at
# init, where log_w = 0).
# TODO(synk): add a reflection/clamp branch if log_w is trained below ln(0.5).
_HALF_G = 5.5                      # g + 0.5
_LANCZOS_C0 = 1.000000000190015
_LANCZOS_COEF = (
    76.18009172947146,
    -86.50532032941677,
    24.01409824083091,
    -1.231739572450155,
    0.1208650973866179e-2,
    -0.5395239384953e-5,
)
_N_TERMS = len(_LANCZOS_COEF)      # 6


def _build_lanczos_rational():
    """Combine the Lanczos partial fractions into a single rational P(z)/Q(z)."""
    q = np.array([1.0])
    for j in range(1, _N_TERMS + 1):
        q = np.convolve(q, np.array([1.0, float(j)]))            # Q *= (z + j)
    p = _LANCZOS_C0 * q
    for j in range(1, _N_TERMS + 1):
        pj = np.array([1.0])
        for k in range(1, _N_TERMS + 1):
            if k != j:
                pj = np.convolve(pj, np.array([1.0, float(k)]))  # prod_{k!=j}(z+k)
        p = p + _LANCZOS_COEF[j - 1] * np.concatenate(
            [np.zeros(len(p) - len(pj)), pj])
    return tuple(float(x) for x in p), tuple(float(x) for x in q)


_P_COEFS, _Q_COEFS = _build_lanczos_rational()   # both degree 6


def _horner(coefs, z):
    acc = jnp.full_like(z, coefs[0])
    for c in coefs[1:]:
        acc = acc * z + c
    return acc


def _nb_f(p, t, r):
    """Per-element NB loss minus the per-element constant c(r).

    f = (t+r)*log(p+r) - t*log(p) + lgamma(t+1) - lgamma(t+r) - (r-1)
    with the lgamma difference evaluated via a single Lanczos rational
    A(z) = P(z)/Q(z):
        lgamma(t+1) - lgamma(t+r) = (t+0.5)*log(t+5.5) - (s-0.5)*log(tr+5.5)
                                    + log(A(t)/A(tr)) + (r-1)
    where s = t + r, tr = s - 1.  The (r-1) term is hoisted into the wrapper
    constant.  Used elementwise inside the kernel AND as a scalar for the
    padding correction, so padded contributions cancel (near-)exactly.
    """
    s = t + r                       # CSE: t + r computed once
    tr = s - 1.0                    # z argument for lgamma(t + r)
    pr = p + r

    p_t = _horner(_P_COEFS, t)
    q_t = _horner(_Q_COEFS, t)
    p_tr = _horner(_P_COEFS, tr)
    q_tr = _horner(_Q_COEFS, tr)
    # two O(1)-magnitude ratios keep intermediates well inside f32 range
    log_a_ratio = jnp.log((p_t / p_tr) * (q_tr / q_t))

    return (s * jnp.log(pr)
            - t * jnp.log(p)
            + (t + 0.5) * jnp.log(t + _HALF_G)
            - (s - 0.5) * jnp.log(tr + _HALF_G)
            + log_a_ratio)


def _round_up(x, m):
    return ((x + m - 1) // m) * m


def _nb_loss_kernel(r_ref, preds_ref, targets_ref, partial_ref, *, block_rows):
    r = r_ref[0]
    f = _nb_f(preds_ref[...], targets_ref[...], r)
    # In-block reduction to one lane-dense (8, 128) partial tile: the reshape
    # keeps (8, 128) vreg tiles intact, so this is just vector adds.
    partial_ref[...] = jnp.sum(f.reshape(block_rows // 8, 8, _LANES), axis=0)


def nb_loss(preds, targets, log_w, loss_sum=True):
    """Pallas equivalent of NBLossWrapper(loss_sum).forward(preds, targets)."""
    n = preds.size
    p_flat = preds.reshape(-1).astype(jnp.float32)
    t_flat = targets.reshape(-1).astype(jnp.float32)

    rows = -(-n // _LANES)
    # >= _MIN_GRID_STEPS blocks when possible (megacore load-balance), capped
    # at 2 MiB/input tile, rows always a multiple of 8.
    block_rows = min(_MAX_BLOCK_ROWS, _round_up(-(-rows // _MIN_GRID_STEPS), 8))
    padded_rows = _round_up(rows, block_rows)
    padded_n = padded_rows * _LANES
    pad_count = padded_n - n
    if pad_count:
        # pad with (p=1, t=0): finite everywhere; contribution is subtracted
        # exactly in the wrapper via f_pad (same Lanczos rational, no mask).
        p_flat = jnp.pad(p_flat, (0, pad_count), constant_values=1.0)
        t_flat = jnp.pad(t_flat, (0, pad_count), constant_values=0.0)
    p2 = p_flat.reshape(padded_rows, _LANES)
    t2 = t_flat.reshape(padded_rows, _LANES)
    num_blocks = padded_rows // block_rows

    # --- scalar-only math hoisted out of the kernel ---
    log_w_s = log_w.reshape(()).astype(jnp.float32)
    r = jnp.exp(log_w_s)

    kernel = functools.partial(_nb_loss_kernel, block_rows=block_rows)

    partials = pl.pallas_call(
        kernel,
        out_shape=jax.ShapeDtypeStruct((num_blocks * 8, _LANES), jnp.float32),
        grid=(num_blocks,),
        in_specs=[
            pl.BlockSpec(memory_space=pltpu.SMEM),                   # r scalar
            pl.BlockSpec((block_rows, _LANES), lambda i: (i, 0)),    # preds tile
            pl.BlockSpec((block_rows, _LANES), lambda i: (i, 0)),    # targets tile
        ],
        out_specs=pl.BlockSpec((8, _LANES), lambda i: (i, 0)),       # partial sums
        compiler_params=pltpu.CompilerParams(
            dimension_semantics=("parallel",),       # lets v7x use both TCs
            vmem_limit_bytes=32 * 1024 * 1024),
    )(r.reshape(1), p2, t2)

    total = jnp.sum(partials)
    if pad_count:
        # same rational as the kernel, so the padded contribution cancels
        f_pad = _nb_f(jnp.float32(1.0), jnp.float32(0.0), r)
        total = total - jnp.float32(pad_count) * f_pad

    # per-valid-element constant: -r*log_w + lgamma(r) + (r-1) + 1e-5
    c = -r * log_w_s + gammaln(r) + (r - 1.0) + 1e-05
    total = total + jnp.float32(n) * c
    if loss_sum:
        return total
    return total / jnp.float32(n)


if __name__ == "__main__":
    key = jax.random.PRNGKey(0)

    # shape 1: NCHW, 2048 elements, divides evenly (no padding path)
    # shape 2: odd element count (1155) to exercise the pad-correction path
    for shape in ((2, 4, 16, 16), (3, 5, 7, 11)):
        kp, kt, key = jax.random.split(key, 3)
        preds = jax.random.uniform(kp, shape, jnp.float32, minval=0.1, maxval=5.0)
        targets = jnp.floor(
            jax.random.uniform(kt, shape, jnp.float32, minval=0.0, maxval=10.0))

        # Check at parameter init (log_w = 0, like nn.Parameter(torch.zeros(1)))
        # and at a non-trivial value to exercise the in-kernel Lanczos path.
        for lw in (0.0, 0.3):
            log_w = jnp.full((1,), lw, jnp.float32)
            out_sum = nb_loss(preds, targets, log_w, loss_sum=True)
            out_mean = nb_loss(preds, targets, log_w, loss_sum=False)
            jax.block_until_ready((out_sum, out_mean))

            r = jnp.exp(log_w)
            ref = ((targets + r) * jnp.log(preds + r)
                   - targets * jnp.log(preds)
                   - r * log_w
                   + gammaln(r)
                   - gammaln(targets + r)
                   + gammaln(targets + 1.0)
                   + 1e-05)
            assert jnp.allclose(out_sum, ref.sum(), rtol=1e-3, atol=1e-2), \
                (shape, lw, out_sum, ref.sum())
            assert jnp.allclose(out_mean, ref.mean(), rtol=1e-3, atol=1e-4), \
                (shape, lw, out_mean, ref.mean())

    print("KERNEL_OK")
</pallas_src>

<mosaic_0001>
module attributes {stable_mosaic.version = 11 : i64} {
  func.func @_nb_loss_kernel(%arg0: i32, %arg1: memref<1xf32, #tpu.memory_space<smem>>, %arg2: memref<8x128xf32, #tpu.memory_space<vmem>>, %arg3: memref<8x128xf32, #tpu.memory_space<vmem>>, %arg4: memref<8x128xf32, #tpu.memory_space<vmem>>) attributes {dimension_semantics = [#tpu.dimension_semantics<parallel>], iteration_bounds = array<i64: 2>, scalar_prefetch = 0 : i64, scratch_operands = 0 : i64, tpu.core_type = #tpu.core_type<tc>, window_params = [{transform_indices = @transform_0, window_bounds = array<i64: 1>}, {transform_indices = @transform_1, window_bounds = array<i64: 8, 128>}, {transform_indices = @transform_2, window_bounds = array<i64: 8, 128>}, {transform_indices = @transform_3, window_bounds = array<i64: 8, 128>}]} {
    %c0 = arith.constant 0 : index
    %0 = memref.load %arg1[%c0] : memref<1xf32, #tpu.memory_space<smem>>
    %c0_0 = arith.constant 0 : index
    %c0_1 = arith.constant 0 : index
    %1 = vector.load %arg2[%c0_0, %c0_1] : memref<8x128xf32, #tpu.memory_space<vmem>>, vector<8x128xf32>
    %c0_2 = arith.constant 0 : index
    %c0_3 = arith.constant 0 : index
    %2 = vector.load %arg3[%c0_2, %c0_3] : memref<8x128xf32, #tpu.memory_space<vmem>>, vector<8x128xf32>
    %3 = vector.broadcast %0 : f32 to vector<8x128xf32>
    %4 = arith.addf %2, %3 : vector<8x128xf32>
    %cst = arith.constant 1.000000e+00 : f32
    %5 = vector.broadcast %cst : f32 to vector<8x128xf32>
    %6 = arith.subf %4, %5 : vector<8x128xf32>
    %7 = vector.broadcast %0 : f32 to vector<8x128xf32>
    %8 = arith.addf %1, %7 : vector<8x128xf32>
    %cst_4 = arith.constant 1.000000e+00 : f32
    %9 = vector.broadcast %cst_4 : f32 to vector<8x128xf32>
    %10 = arith.mulf %9, %2 : vector<8x128xf32>
    %cst_5 = arith.constant 33.4583321 : f32
    %11 = vector.broadcast %cst_5 : f32 to vector<8x128xf32>
    %12 = arith.addf %10, %11 : vector<8x128xf32>
    %13 = arith.mulf %12, %2 : vector<8x128xf32>
    %cst_6 = arith.constant 466.334198 : f32
    %14 = vector.broadcast %cst_6 : f32 to vector<8x128xf32>
    %15 = arith.addf %13, %14 : vector<8x128xf32>
    %16 = arith.mulf %15, %2 : vector<8x128xf32>
    %cst_7 = arith.constant 3465.70947 : f32
    %17 = vector.broadcast %cst_7 : f32 to vector<8x128xf32>
    %18 = arith.addf %16, %17 : vector<8x128xf32>
    %19 = arith.mulf %18, %2 : vector<8x128xf32>
    %cst_8 = arith.constant 14484.9141 : f32
    %20 = vector.broadcast %cst_8 : f32 to vector<8x128xf32>
    %21 = arith.addf %19, %20 : vector<8x128xf32>
    %22 = arith.mulf %21, %2 : vector<8x128xf32>
    %cst_9 = arith.constant 32281.0645 : f32
    %23 = vector.broadcast %cst_9 : f32 to vector<8x128xf32>
    %24 = arith.addf %22, %23 : vector<8x128xf32>
    %25 = arith.mulf %24, %2 : vector<8x128xf32>
    %cst_10 = arith.constant 29969.5938 : f32
    %26 = vector.broadcast %cst_10 : f32 to vector<8x128xf32>
    %27 = arith.addf %25, %26 : vector<8x128xf32>
    %cst_11 = arith.constant 1.000000e+00 : f32
    %28 = vector.broadcast %cst_11 : f32 to vector<8x128xf32>
    %29 = arith.mulf %28, %2 : vector<8x128xf32>
    %cst_12 = arith.constant 2.100000e+01 : f32
    %30 = vector.broadcast %cst_12 : f32 to vector<8x128xf32>
    %31 = arith.addf %29, %30 : vector<8x128xf32>
    %32 = arith.mulf %31, %2 : vector<8x128xf32>
    %cst_13 = arith.constant 1.750000e+02 : f32
    %33 = vector.broadcast %cst_13 : f32 to vector<8x128xf32>
    %34 = arith.addf %32, %33 : vector<8x128xf32>
    %35 = arith.mulf %34, %2 : vector<8x128xf32>
    %cst_14 = arith.constant 7.350000e+02 : f32
    %36 = vector.broadcast %cst_14 : f32 to vector<8x128xf32>
    %37 = arith.addf %35, %36 : vector<8x128xf32>
    %38 = arith.mulf %37, %2 : vector<8x128xf32>
    %cst_15 = arith.constant 1.624000e+03 : f32
    %39 = vector.broadcast %cst_15 : f32 to vector<8x128xf32>
    %40 = arith.addf %38, %39 : vector<8x128xf32>
    %41 = arith.mulf %40, %2 : vector<8x128xf32>
    %cst_16 = arith.constant 1.764000e+03 : f32
    %42 = vector.broadcast %cst_16 : f32 to vector<8x128xf32>
    %43 = arith.addf %41, %42 : vector<8x128xf32>
    %44 = arith.mulf %43, %2 : vector<8x128xf32>
    %cst_17 = arith.constant 7.200000e+02 : f32
    %45 = vector.broadcast %cst_17 : f32 to vector<8x128xf32>
    %46 = arith.addf %44, %45 : vector<8x128xf32>
    %cst_18 = arith.constant 1.000000e+00 : f32
    %47 = vector.broadcast %cst_18 : f32 to vector<8x128xf32>
    %48 = arith.mulf %47, %6 : vector<8x128xf32>
    %cst_19 = arith.constant 33.4583321 : f32
    %49 = vector.broadcast %cst_19 : f32 to vector<8x128xf32>
    %50 = arith.addf %48, %49 : vector<8x128xf32>
    %51 = arith.mulf %50, %6 : vector<8x128xf32>
    %cst_20 = arith.constant 466.334198 : f32
    %52 = vector.broadcast %cst_20 : f32 to vector<8x128xf32>
    %53 = arith.addf %51, %52 : vector<8x128xf32>
    %54 = arith.mulf %53, %6 : vector<8x128xf32>
    %cst_21 = arith.constant 3465.70947 : f32
    %55 = vector.broadcast %cst_21 : f32 to vector<8x128xf32>
    %56 = arith.addf %54, %55 : vector<8x128xf32>
    %57 = arith.mulf %56, %6 : vector<8x128xf32>
    %cst_22 = arith.constant 14484.9141 : f32
    %58 = vector.broadcast %cst_22 : f32 to vector<8x128xf32>
    %59 = arith.addf %57, %58 : vector<8x128xf32>
    %60 = arith.mulf %59, %6 : vector<8x128xf32>
    %cst_23 = arith.constant 32281.0645 : f32
    %61 = vector.broadcast %cst_23 : f32 to vector<8x128xf32>
    %62 = arith.addf %60, %61 : vector<8x128xf32>
    %63 = arith.mulf %62, %6 : vector<8x128xf32>
    %cst_24 = arith.constant 29969.5938 : f32
    %64 = vector.broadcast %cst_24 : f32 to vector<8x128xf32>
    %65 = arith.addf %63, %64 : vector<8x128xf32>
    %cst_25 = arith.constant 1.000000e+00 : f32
    %66 = vector.broadcast %cst_25 : f32 to vector<8x128xf32>
    %67 = arith.mulf %66, %6 : vector<8x128xf32>
    %cst_26 = arith.constant 2.100000e+01 : f32
    %68 = vector.broadcast %cst_26 : f32 to vector<8x128xf32>
    %69 = arith.addf %67, %68 : vector<8x128xf32>
    %70 = arith.mulf %69, %6 : vector<8x128xf32>
    %cst_27 = arith.constant 1.750000e+02 : f32
    %71 = vector.broadcast %cst_27 : f32 to vector<8x128xf32>
    %72 = arith.addf %70, %71 : vector<8x128xf32>
    %73 = arith.mulf %72, %6 : vector<8x128xf32>
    %cst_28 = arith.constant 7.350000e+02 : f32
    %74 = vector.broadcast %cst_28 : f32 to vector<8x128xf32>
    %75 = arith.addf %73, %74 : vector<8x128xf32>
    %76 = arith.mulf %75, %6 : vector<8x128xf32>
    %cst_29 = arith.constant 1.624000e+03 : f32
    %77 = vector.broadcast %cst_29 : f32 to vector<8x128xf32>
    %78 = arith.addf %76, %77 : vector<8x128xf32>
    %79 = arith.mulf %78, %6 : vector<8x128xf32>
    %cst_30 = arith.constant 1.764000e+03 : f32
    %80 = vector.broadcast %cst_30 : f32 to vector<8x128xf32>
    %81 = arith.addf %79, %80 : vector<8x128xf32>
    %82 = arith.mulf %81, %6 : vector<8x128xf32>
    %cst_31 = arith.constant 7.200000e+02 : f32
    %83 = vector.broadcast %cst_31 : f32 to vector<8x128xf32>
    %84 = arith.addf %82, %83 : vector<8x128xf32>
    %85 = arith.divf %27, %65 : vector<8x128xf32>
    %86 = arith.divf %84, %46 : vector<8x128xf32>
    %87 = arith.mulf %85, %86 : vector<8x128xf32>
    %88 = math.log %87 : vector<8x128xf32>
    %89 = math.log %8 : vector<8x128xf32>
    %90 = arith.mulf %4, %89 : vector<8x128xf32>
    %91 = math.log %1 : vector<8x128xf32>
    %92 = arith.mulf %2, %91 : vector<8x128xf32>
    %93 = arith.subf %90, %92 : vector<8x128xf32>
    %cst_32 = arith.constant 5.000000e-01 : f32
    %94 = vector.broadcast %cst_32 : f32 to vector<8x128xf32>
    %95 = arith.addf %2, %94 : vector<8x128xf32>
    %cst_33 = arith.constant 5.500000e+00 : f32
    %96 = vector.broadcast %cst_33 : f32 to vector<8x128xf32>
    %97 = arith.addf %2, %96 : vector<8x128xf32>
    %98 = math.log %97 : vector<8x128xf32>
    %99 = arith.mulf %95, %98 : vector<8x128xf32>
    %100 = arith.addf %93, %99 : vector<8x128xf32>
    %cst_34 = arith.constant 5.000000e-01 : f32
    %101 = vector.broadcast %cst_34 : f32 to vector<8x128xf32>
    %102 = arith.subf %4, %101 : vector<8x128xf32>
    %cst_35 = arith.constant 5.500000e+00 : f32
    %103 = vector.broadcast %cst_35 : f32 to vector<8x128xf32>
    %104 = arith.addf %6, %103 : vector<8x128xf32>
    %105 = math.log %104 : vector<8x128xf32>
    %106 = arith.mulf %102, %105 : vector<8x128xf32>
    %107 = arith.subf %100, %106 : vector<8x128xf32>
    %108 = arith.addf %107, %88 : vector<8x128xf32>
    %109 = vector.shape_cast %108 : vector<8x128xf32> to vector<1x8x128xf32>
    %cst_36 = arith.constant dense<0.000000e+00> : vector<8x128xf32>
    %110 = vector.multi_reduction <add>, %109, %cst_36 [0] : vector<1x8x128xf32> to vector<8x128xf32>
    %c0_37 = arith.constant 0 : index
    %c0_38 = arith.constant 0 : index
    %111 = vector.load %arg4[%c0_37, %c0_38] : memref<8x128xf32, #tpu.memory_space<vmem>>, vector<8x128xf32>
    tpu.vector_store %arg4[%c0_37, %c0_38], %110 {strides = array<i32>} : memref<8x128xf32, #tpu.memory_space<vmem>>, vector<8x128xf32>,
    return
  }
  func.func @transform_0(%arg0: i32) -> i32 {
    %c0_i32 = arith.constant 0 : i32
    %c0_i32_0 = arith.constant 0 : i32
    return %c0_i32 : i32
  }
  func.func @transform_1(%arg0: i32) -> (i32, i32) {
    %c0_i32 = arith.constant 0 : i32
    %c0_i32_0 = arith.constant 0 : i32
    return %arg0, %c0_i32 : i32, i32
  }
  func.func @transform_2(%arg0: i32) -> (i32, i32) {
    %c0_i32 = arith.constant 0 : i32
    %c0_i32_0 = arith.constant 0 : i32
    return %arg0, %c0_i32 : i32, i32
  }
  func.func @transform_3(%arg0: i32) -> (i32, i32) {
    %c0_i32 = arith.constant 0 : i32
    %c0_i32_0 = arith.constant 0 : i32
    return %arg0, %c0_i32 : i32, i32
  }
}

</mosaic_0001>

<bundles_post_ra>
// kernel: tpu_custom_call.1
= control target key start
LH: loop header
LB: loop body
LE: loop exit
PB: predicated region body
PF: predicated region fallthrough
CT: control target
= control target key end

     0   :  { %s893_s0 = inlined_call_operand.<no memory space> [shape: f32[1], index: 0, kind: input, shape index: {}]   ;;  %s894_s1 = inlined_call_operand.hbm [shape: f32[16,128], index: 1, kind: input, shape index: {}]   ;;  %s895_s2 = inlined_call_operand.hbm [shape: f32[16,128], index: 2, kind: input, shape index: {}]   ;;  %s896_s3 = inlined_call_operand.hbm [shape: f32[16,128], index: 3, kind: output, shape index: {}]  }
   0x1   :  { %8 = sst [smem:[#allocation2]] %s893_s0 }
   0x2   :  { %9 = vsyncpa [#allocation4], 0 }
   0x3   :  { %11 = vsyncpa [#allocation4 + $0x1], 0 }
   0x4   :  { %12 = vsyncpa [#allocation7], 0 }
   0x5   :  { %14 = vsyncpa [#allocation7 + $0x1], 0 }
   0x6   :  { %15 = vsyncpa [#allocation5], 0 }
   0x7   :  { %17 = vsyncpa [#allocation5 + $0x1], 0  ;;  %s651_s14 = smov 0   ;;  %s653_s15 = smov 0  }
   0x8   :  { %s655_s16 = smov 0   ;;  %s657_s17 = smov 0  }
   0x9 LB: > { %s672_s0 = sadd.s32 4294967295, %s623_s17   ;;  %s411_s18 = sadd.s32 4294967294, %s623_s17   ;;  %s623_s17 = sphi %s657_s17, %s915_s17   ;;  %s619_s16 = sphi %s655_s16, %s914_s16   ;;  %s615_s15 = sphi %s653_s15, %s913_s15   ;;  %s611_s14 = sphi %s651_s14, %s912_s14  }
   0xa   : > { %s676_s19 = sadd.s32 1, %s623_s17   ;;  %s51_s20 = sadd.s32 1, %s619_s16 }
   0xb   : > { %s48_s21 = ssub.s32 %s623_s17, %s676_s19  ;;  %p58_p0 = scmp.ne.s32.totalorder %s619_s16, %s615_s15 }
   0xc   : > { %p49_p1 = scmp.eq.s32.totalorder %s48_s21, 0  ;;  %p59_p2 = scmp.eq.s32.totalorder %s623_s17, 0 }
   0xd   : > { %p64_p3 = scmp.ne.s32.totalorder %s615_s15, %s611_s14  ;;  %p65_p4 = scmp.eq.s32.totalorder %s672_s0, 0 }
   0xe   : > { %s688_s22 = scalar_select %p49_p1, %s619_s16, %s51_s20  }
   0xf   : > { %p690_p5 = por %p59_p2, %p58_p0  ;;  %p694_p6 = por %p65_p4, %p64_p3 }
  0x10   : > { %p114_p7 = scmp.eq.s32.totalorder %s672_s0, 1  ;;  %p120_p8 = scmp.eq.s32.totalorder %s411_s18, 1 }
  0x11   : > { %s900_s24 = scalar_select %p694_p6, 1, 0 }
  0x12   : > { %p445_p10 = scmp.lt.s32.totalorder %s623_s17, 2  ;;  %p701_p11 = por %p114_p7, %p58_p0 }
  0x13   : > { %p705_p12 = por %p120_p8, %p64_p3  ;;  %s710_s27 = sand.u32 1, %s619_s16  }
  0x14   : > { %s901_s25 = scalar_select %p701_p11, 1, 0 }
  0x15   : > { %s902_s26 = scalar_select %p705_p12, 1, 0 }
  0x16   : > { %s415_s28 = sshll.u32 %s623_s17, 7  ;;  %s414_s29 = sshll.u32 %s710_s27, 3 }
  0x17   : > { %s719_s5 = scalar_lea.hbm %s894_s1, %s415_s28  ;;  %s147_s6 = scalar_lea.vmem [#allocation3], %s414_s29 }
  0x18   : > { %s154_s7 = sshll.u32 %s147_s6, 4  ;;  %p725_p13 = pnand %p445_p10, %p690_p5  ;;  %s729_s7 = int_to_ptr.vmem [resolvable:$true] %s154_s7 }
  0x19   : > { %s144_s9 = scalar_lea.sflag [#allocation4], %s710_s27  ;;  %s493_s10 = scalar_lea.hbm %s719_s5, 128 }
  0x1a   : > { %p494_p2 = scmp.ne.s32.totalorder %s719_s5, %s493_s10  ;;  %p495_p3 = pneg %p725_p13 }
  0x1b   : > { %s498_s13 = scalar_lea.hbm %s894_s1, 256  ;;  %p499_p5 = scmp.lt.u32.totalorder %s719_s5, %s894_s1 }
  0x1c   : > { %p496_p4 = pnand %p495_p3, %p494_p2  ;;  %p500_p8 = scmp.lt.u32.totalorder %s498_s13, %s493_s10 }
  0x1d   : > { %p502_p9 = scmp.lt.u32.totalorder %s493_s10, %s719_s5 }
  0x1e   : > { %p497_p7 = pneg %p496_p4  ;;  %p501_p10 = por %p500_p8, %p499_p5 }
  0x20   : > { %p503_p0 = por %p502_p9, %p501_p10 }
  0x22   : > { %p504_p1 = pnand %p503_p0, %p497_p7 }
  0x24   : > { %507 = shalt.err (!%p504_p1)
}
  0x25   : > { %s508_s21 = scalar_lea.vmem %s729_s7, 128  ;;  %s625_s23 = smov [#allocation3]  }
  0x26   : > { %p509_p2 = scmp.ne.s32.totalorder %s729_s7, %s508_s21  ;;  %s513_s30 = sshll.u32 %s625_s23, 4  ;;  %s514_s30 = int_to_ptr.vmem [resolvable:$false] %s513_s30 }
  0x27   : > { %s515_s4 = scalar_lea.vmem %s514_s30, 256  ;;  %p516_p11 = scmp.lt.s32.totalorder %s729_s7, %s514_s30 }
  0x28   : > { %p511_p4 = pnand %p509_p2, %p495_p3  ;;  %p517_p5 = scmp.lt.s32.totalorder %s515_s4, %s508_s21 }
  0x2a   : > { %p512_p12 = pneg %p511_p4  ;;  %p518_p8 = por %p517_p5, %p516_p11 }
  0x2c   : > { %p519_p9 = pnand %p518_p8, %p512_p12 }
  0x2e   : > { %522 = shalt.err (!%p519_p9)
}
  0x2f   : > { %437 = dma.hbm_to_vmem [thread:$0]  (!%p725_p13), %s719_s5, 128, %s729_s7, %s144_s9  }
  0x30   : > { %p904_p0 = scmp.lt.s32.totalorder %s623_s17, 3  ;;  %p905_p1 = scmp.ge.s32.totalorder %s623_s17, 1 }
  0x31   : > { %s772_s12 = scalar_lea.hbm %s895_s2, %s415_s28  ;;  %s165_s13 = scalar_lea.vmem [#allocation6], %s414_s29 }
  0x32   : > { %p763_p7 = pnand %p905_p1, %p904_p0  ;;  %s172_s18 = sshll.u32 %s165_s13, 4  ;;  %s173_s18 = int_to_ptr.vmem [resolvable:$true] %s172_s18 }
  0x33   : > { %s162_s5 = scalar_lea.sflag [#allocation7], %s710_s27  ;;  %s523_s7 = scalar_lea.hbm %s772_s12, 128 }
  0x34   : > { %s906_s6 = scalar_select %p763_p7, 1, 0 }
  0x35   : > { %p524_p11 = scmp.ne.s32.totalorder %s772_s12, %s523_s7  ;;  %s528_s28 = scalar_lea.hbm %s895_s2, 256 }
  0x36   : > { %p529_p2 = scmp.lt.u32.totalorder %s772_s12, %s895_s2  ;;  %p530_p4 = scmp.lt.u32.totalorder %s528_s28, %s523_s7 }
  0x37   : > { %p526_p12 = pnand %p524_p11, %p495_p3  ;;  %p532_p8 = scmp.lt.u32.totalorder %s523_s7, %s772_s12 }
  0x38   : > { %p531_p5 = por %p530_p4, %p529_p2 }
  0x39   : > { %p527_p10 = pneg %p526_p12 }
  0x3a   : > { %p533_p9 = por %p532_p8, %p531_p5 }
  0x3c   : > { %p534_p0 = pnand %p533_p9, %p527_p10 }
  0x3e   : > { %537 = shalt.err (!%p534_p0)
}
  0x3f   : > { %s538_s27 = scalar_lea.vmem %s173_s18, 128  ;;  %s626_s29 = smov [#allocation6]  }
  0x40   : > { %p539_p1 = scmp.ne.s32.totalorder %s173_s18, %s538_s27  ;;  %s543_s30 = sshll.u32 %s626_s29, 4  ;;  %s544_s30 = int_to_ptr.vmem [resolvable:$false] %s543_s30 }
  0x41   : > { %s545_s4 = scalar_lea.vmem %s544_s30, 256  ;;  %p546_p6 = scmp.lt.s32.totalorder %s173_s18, %s544_s30 }
  0x42   : > { %p541_p11 = pnand %p539_p1, %p495_p3  ;;  %p547_p7 = scmp.lt.s32.totalorder %s545_s4, %s538_s27 }
  0x44   : > { %p542_p12 = pneg %p541_p11  ;;  %p548_p2 = por %p547_p7, %p546_p6 }
  0x46   : > { %p549_p4 = pnand %p548_p2, %p542_p12 }
  0x48   : > { %552 = shalt.err (!%p549_p4)
}
  0x49   : > { %440 = dma.hbm_to_vmem [thread:$0]  (!%p725_p13), %s772_s12, 128, %s173_s18, %s162_s5  }
  0x4a   : > { %p907_p10 = scmp.ne.s32.totalorder %s906_s6, 0 }
  0x4b   : > { %s799_s10 = sand.u32 (!%p907_p10), 1, %s615_s15   ;;  %p908_p6 = scmp.ne.s32.totalorder (!%p907_p10), %s900_s24, 0 }
  0x4c   : > { %181 = sbr.rel (%p907_p10) target bundleno = 163 (0xa3), region = 32  ;;  %s802_s11 = sshll.u32 (!%p907_p10), %s799_s10, 3 }
  0x4d   : > { %s184_s13 = scalar_lea.sflag (!%p907_p10), [#allocation4], %s799_s10  ;;  %s187_s7 = scalar_lea.vmem (!%p907_p10), [#allocation3], %s802_s11 }
  0x53   : > { %598 = dma.done.wait (%p908_p6), %s184_s13, 128  }
  0x54   : > { %600 = vsyncadd (%p908_p6), %s184_s13, 4294967168  ;;  %s193_s8 = scalar_lea.sflag [#allocation7], %s799_s10  ;;  %s196_s6 = scalar_lea.vmem [#allocation6], %s802_s11 }
  0x55   : > { %602 = dma.done.wait (%p908_p6), %s193_s8, 128  }
  0x56   : > { %604 = vsyncadd (%p908_p6), %s193_s8, 4294967168  ;;  %s816_s12 = sld [smem:[#allocation2]]  ;;  %v818_v0 = vld [vmem:[%s196_s6] sm:$0xff]  ;;  %v225_v27 = vld [vmem:[%s187_s7] sm:$0xff]  ;;  %s223_s24 = scalar_lea.vmem [#allocation8], %s802_s11 }
  0x57   : > { %v231_v3 = vadd.f32 33.458332, %v818_v0  ;;  %v242_v4 = vadd.f32 21.0, %v818_v0  ;;  %479 = vlog2.f32 %v225_v27  ;;  %v290_v42 = vadd.f32 5.5, %v818_v0  ;;  %s318_s18 = sshll.u32 %s223_s24, 4  ;;  %s425_s5 = sshll.u32 %s672_s0, 7  ;;  %s846_s18 = int_to_ptr.vmem [resolvable:$true] %s318_s18 }
  0x58   : > { %v289_v63 = vadd.f32 0.5, %v818_v0  ;;  %s851_s28 = scalar_lea.hbm %s896_s3, %s425_s5  ;;  %s305_s21 = scalar_lea.sflag [#allocation5], %s799_s10 }
  0x59   : > { %v232_v6 = vmul.f32 %v231_v3, %v818_v0  ;;  %v243_v7 = vmul.f32 %v242_v4, %v818_v0  ;;  %s553_s23 = scalar_lea.vmem %s846_s18, 128  ;;  %p909_p3 = scmp.ne.s32.totalorder %s901_s25, 0 }
  0x5a   : > { %p554_p13 = scmp.ne.s32.totalorder %s846_s18, %s553_s23  ;;  %s627_s0 = smov [#allocation8]  }
  0x5b   : > { %v233_v8 = vadd.f32 466.3342, %v232_v6  ;;  %v244_v11 = vadd.f32 175.0, %v243_v7  ;;  %s557_s27 = sshll.u32 %s627_s0, 4  ;;  %s558_s27 = int_to_ptr.vmem [resolvable:$false] %s557_s27 }
  0x5c   : > { %v227_v1 = vstv %s816_s12  ;;  %p555_p7 = pnand %p554_p13, %p909_p3  ;;  %s559_s29 = scalar_lea.vmem %s558_s27, 256 }
  0x5d   : > { %v822_v2 = vadd.f32 %v227_v1, %v818_v0  ;;  %v234_v12 = vmul.f32 %v233_v8, %v818_v0  ;;  %v245_v15 = vmul.f32 %v244_v11, %v818_v0  ;;  %v230_v33 = vadd.f32 %v227_v1, %v225_v27  ;;  %p560_p8 = scmp.lt.s32.totalorder %s846_s18, %s558_s27  ;;  %p561_p9 = scmp.lt.s32.totalorder %s559_s29, %s553_s23 }
  0x5e   : > { %p556_p5 = pneg %p555_p7 }
  0x5f   : > { %v422_v5 = vadd.f32 -1.0, %v822_v2  ;;  %v235_v18 = vadd.f32 3465.7095, %v234_v12  ;;  %v246_v19 = vadd.f32 735.0, %v245_v15  ;;  %481 = vlog2.f32 %v230_v33  ;;  %p562_p0 = por %p561_p9, %p560_p8 }
  0x60   : > { %v423_v7 = vadd.f32 -0.5, %v822_v2 }
  0x61   : > { %v253_v9 = vadd.f32 33.458332, %v422_v5  ;;  %v264_v10 = vadd.f32 21.0, %v422_v5  ;;  %v247_v22 = vmul.f32 %v246_v19, %v818_v0  ;;  %v236_v25 = vmul.f32 %v235_v18, %v818_v0  ;;  %v480_v50 = vpop.eup %479  ;;  %p563_p1 = pnand %p562_p0, %p556_p5 }
  0x62   : > { %v296_v47 = vadd.f32 5.5, %v422_v5  ;;  %v286_v56 = vmul.f32 0.6931472, %v480_v50 }
  0x63   : > { %v254_v13 = vmul.f32 %v422_v5, %v253_v9  ;;  %v265_v14 = vmul.f32 %v422_v5, %v264_v10  ;;  %v248_v26 = vadd.f32 1624.0, %v247_v22  ;;  %v237_v34 = vadd.f32 14484.914, %v236_v25 }
  0x64   : > { %v287_v62 = vmul.f32 %v286_v56, %v818_v0 }
  0x65   : > { %v255_v16 = vadd.f32 466.3342, %v254_v13  ;;  %v266_v17 = vadd.f32 175.0, %v265_v14  ;;  %v249_v30 = vmul.f32 %v248_v26, %v818_v0  ;;  %v238_v40 = vmul.f32 %v237_v34, %v818_v0 }
  0x67   : > { %v256_v20 = vmul.f32 %v422_v5, %v255_v16  ;;  %v267_v21 = vmul.f32 %v422_v5, %v266_v17  ;;  %v250_v35 = vadd.f32 1764.0, %v249_v30  ;;  %v239_v46 = vadd.f32 32281.064, %v238_v40 }
  0x69   : > { %v257_v23 = vadd.f32 3465.7095, %v256_v20  ;;  %v268_v24 = vadd.f32 735.0, %v267_v21  ;;  %v251_v37 = vmul.f32 %v250_v35, %v818_v0  ;;  %v240_v49 = vmul.f32 %v239_v46, %v818_v0  ;;  %v482_v51 = vpop.eup %481 }
  0x6a   : > { %v283_v55 = vmul.f32 0.6931472, %v482_v51 }
  0x6b   : > { %v258_v28 = vmul.f32 %v422_v5, %v257_v23  ;;  %v269_v29 = vmul.f32 %v422_v5, %v268_v24  ;;  %v252_v41 = vadd.f32 720.0, %v251_v37  ;;  %v241_v54 = vadd.f32 29969.594, %v240_v49 }
  0x6c   : > { %v284_v61 = vmul.f32 %v283_v55, %v822_v2 }
  0x6d   : > { %v259_v31 = vadd.f32 14484.914, %v258_v28  ;;  %v270_v32 = vadd.f32 1624.0, %v269_v29  ;;  %483 = vrcp.f32 %v252_v41 }
  0x6e   : > { %485 = vlog2.f32 %v290_v42 }
  0x6f   : > { %v260_v36 = vmul.f32 %v422_v5, %v259_v31  ;;  %v271_v38 = vmul.f32 %v422_v5, %v270_v32 }
  0x71   : > { %v261_v39 = vadd.f32 32281.064, %v260_v36  ;;  %v272_v44 = vadd.f32 1764.0, %v271_v38 }
  0x73   : > { %v262_v43 = vmul.f32 %v422_v5, %v261_v39  ;;  %v273_v48 = vmul.f32 %v422_v5, %v272_v44  ;;  %v288_v5 = vsub.f32 %v284_v61, %v287_v62 }
  0x75   : > { %v263_v45 = vadd.f32 29969.594, %v262_v43  ;;  %v274_v52 = vadd.f32 720.0, %v273_v48 }
  0x77   : > { %487 = vrcp.f32 %v263_v45  ;;  %v484_v53 = vpop.eup %483 }
  0x78   : > { %489 = vlog2.f32 %v296_v47  ;;  %v486_v57 = vpop.eup %485  ;;  %v278_v58 = vmul.f32 %v484_v53, %v274_v52 }
  0x79   : > { %v292_v1 = vmul.f32 0.6931472, %v486_v57 }
  0x7b   : > { %v293_v6 = vmul.f32 %v292_v1, %v289_v63 }
  0x7d   : > { %v294_v9 = vadd.f32 %v293_v6, %v288_v5 }
  0x81   : > { %v488_v59 = vpop.eup %487 }
  0x82   : > { %v276_v60 = vmul.f32 %v488_v59, %v241_v54  ;;  %v490_v3 = vpop.eup %489 }
  0x83   : > { %v298_v8 = vmul.f32 0.6931472, %v490_v3 }
  0x84   : > { %v279_v4 = vmul.f32 %v278_v58, %v276_v60 }
  0x85   : > { %v299_v10 = vmul.f32 %v423_v7, %v298_v8 }
  0x86   : > { %491 = vlog2.f32 %v279_v4 }
  0x87   : > { %v300_v11 = vsub.f32 %v294_v9, %v299_v10 }
  0x90   : > { %v492_v12 = vpop.eup %491 }
  0x91   : > { %v281_v13 = vmul.f32 0.6931472, %v492_v12 }
  0x93   : > { %v301_v0 = vadd.f32 %v300_v11, %v281_v13 }
  0x95   : > { %303 = vst [vmem:[%s223_s24] sm:$0xff] %v301_v0 }
  0x96   : > { %566 = shalt.err (!%p563_p1)
}
  0x97   : > { %s567_s30 = scalar_lea.hbm %s851_s28, 128  ;;  %s571_s11 = scalar_lea.hbm %s896_s3, 256 }
  0x98   : > { %p568_p11 = scmp.ne.s32.totalorder %s851_s28, %s567_s30  ;;  %p572_p4 = scmp.lt.u32.totalorder %s851_s28, %s896_s3 }
  0x99   : > { %p573_p10 = scmp.lt.u32.totalorder %s571_s11, %s567_s30  ;;  %p575_p13 = scmp.lt.u32.totalorder %s567_s30, %s851_s28 }
  0x9a   : > { %p569_p12 = pnand %p568_p11, %p909_p3 }
  0x9b   : > { %p574_p6 = por %p573_p10, %p572_p4 }
  0x9c   : > { %p570_p2 = pneg %p569_p12 }
  0x9d   : > { %p576_p7 = por %p575_p13, %p574_p6 }
  0x9f   : > { %p577_p5 = pnand %p576_p7, %p570_p2 }
  0xa1   : > { %580 = shalt.err (!%p577_p5)
}
  0xa2   : > { %432 = dma.vmem_to_hbm [thread:$0]  (%p909_p3), %s846_s18, 128, %s851_s28, %s305_s21  }
  0xa3 PF: > { %s330_s8 = sand.u32 1, %s611_s14   ;;  %p910_p8 = scmp.ne.s32.totalorder %s902_s26, 0 }
  0xa4   : > { %p911_p9 = scmp.ge.s32.totalorder %s623_s17, 2  ;;  %s331_s6 = scalar_lea.sflag [#allocation5], %s330_s8 }
  0xa6   : > { %p442_p0 = pnand %p911_p9, %p910_p8 }
  0xa8   : > { %606 = dma.done.wait (!%p442_p0), %s331_s6, 128  }
  0xa9   : > { %608 = vsyncadd (!%p442_p0), %s331_s6, 4294967168  ;;  %p20_p1 = scmp.ge.s32.totalorder %s676_s19, 4   ;;  %s912_s14 = smov %s615_s15 }
  0xaa   : > { %s913_s15 = smov %s619_s16  ;;  %s914_s16 = smov %s688_s22 }
  0xab   : > { %s915_s17 = smov %s676_s19  ;;  %22 = sbr.rel (!%p20_p1) target bundleno = 9 (0x9), region = 90 }
  0xb2   :  { %336 = vsyncpa [#allocation4], 1 }
  0xb3   :  { %338 = vsyncpa [#allocation4 + $0x1], 1 }
  0xb4   :  { %339 = vsyncpa [#allocation7], 1 }
  0xb5   :  { %341 = vsyncpa [#allocation7 + $0x1], 1 }
  0xb6   :  { %342 = vsyncpa [#allocation5], 1 }
  0xb7   :  { %344 = vsyncpa [#allocation5 + $0x1], 1 }

</bundles_post_ra>
